<compile_context>
chip_gen: v6e
topology: v6e:2x2x1
jax: 0.10.0
libtpu: 0.0.40
codegen_flags: <defaults>
</compile_context>

<pallas_src>
import functools

import jax
import jax.numpy as jnp
from jax.experimental import pallas as pl
from jax.experimental.pallas import tpu as pltpu


def _attention_kernel(x_ref, wqkv_ref, wo_ref, bo_ref, o_ref, acc_ref,
                      *, matmul_dtype):
    h = pl.program_id(1)
    bt, n, dim = x_ref.shape
    dh = wo_ref.shape[1]                       # dim_head

    @pl.when(h == 0)
    def _init():
        acc_ref[...] = jnp.zeros_like(acc_ref)

    # Per-head qkv projection: one (bt*n, dim) @ (dim, 3*dim_head) MXU matmul.
    # (The attention scale is already folded into the q columns of wqkv_ref.)
    x2 = x_ref[...].reshape(bt * n, dim)                 # already in matmul_dtype
    qkv = jnp.dot(x2, wqkv_ref[0], preferred_element_type=jnp.float32)

    q = qkv[:, 0:dh].reshape(bt, n, dh).astype(matmul_dtype)
    k = qkv[:, dh:2 * dh].reshape(bt, n, dh).astype(matmul_dtype)
    v = qkv[:, 2 * dh:3 * dh].reshape(bt, n, dh).astype(matmul_dtype)

    # Scores: contract head_dim of both operands -- no explicit k.T / vxpose.
    dots = jnp.einsum('bqd,bkd->bqk', q, k,
                      preferred_element_type=jnp.float32)        # (bt, n, n) f32

    # Softmax over keys in f32; the reciprocal lands on the EUP slot.
    m = jnp.max(dots, axis=-1, keepdims=True)
    e = jnp.exp(dots - m)
    l = jnp.sum(e, axis=-1, keepdims=True)
    attn = e * pl.reciprocal(l, approx=True)

    out = jnp.einsum('bqk,bkd->bqd', attn.astype(matmul_dtype), v,
                     preferred_element_type=jnp.float32)         # (bt, n, dh)

    # rearrange('b h n d -> b n (h d)') followed by to_out Linear is exactly
    # sum over heads of out_h @ Wo_h -- accumulate in the f32 scratch.
    acc_ref[...] += jnp.dot(out.reshape(bt * n, dh).astype(matmul_dtype),
                            wo_ref[0],
                            preferred_element_type=jnp.float32)

    @pl.when(h == pl.num_programs(1) - 1)
    def _finalize():
        y = acc_ref[...] + bo_ref[0]                             # (bt*n, dim) f32
        o_ref[...] = y.reshape(bt, n, dim).astype(o_ref.dtype)


def _pick_block_b(batch, n, dim, itemsize, max_rows=1024, max_bytes=2 << 20):
    """Largest batch tile that keeps the x block modest and (when possible) leaves
    >= 2 steps on the parallel batch axis (megacore sharding / DMA overlap)."""
    best = 1
    for cand in range(1, batch + 1):
        if batch % cand:
            continue
        if cand * n > max_rows or cand * n * dim * itemsize > max_bytes:
            continue
        if cand > 1 and batch // cand < 2:
            continue
        best = cand
    return best


def attention(x, wqkv, wo, bo, *, heads, dim_head, block_b=None,
              matmul_dtype=jnp.bfloat16):
    """Pallas TPU forward of the ViT `Attention` module.

    x:    (batch, n, dim)
    wqkv: (dim, 3*heads*dim_head)  -- to_qkv weight stored [in, out] (y = x @ W)
    wo:   (heads*dim_head, dim)    -- to_out Linear weight stored [in, out]
    bo:   (dim,)                   -- to_out Linear bias
    """
    batch, n, dim = x.shape
    inner = heads * dim_head
    assert wqkv.shape == (dim, 3 * inner)
    assert wo.shape == (inner, dim) and bo.shape == (dim,)
    scale = dim_head ** -0.5

    if block_b is None:
        block_b = _pick_block_b(batch, n, dim, jnp.dtype(matmul_dtype).itemsize)
    assert batch % block_b == 0

    # Regroup weights head-major so each (batch_tile, head) grid step streams
    # only that head's slices.  Column order of wqkv is [q|k|v] x head-major,
    # matching torch's chunk(3) + rearrange('b n (h d) -> b h n d').
    wqkv_h = (wqkv.reshape(dim, 3, heads, dim_head)
                  .transpose(2, 0, 1, 3)
                  .reshape(heads, dim, 3 * dim_head))
    # Fold the attention scale into the q columns (x @ (Wq*s) == (x @ Wq)*s).
    qkv_scale = jnp.concatenate(
        [jnp.full((dim_head,), scale, jnp.float32),
         jnp.ones((2 * dim_head,), jnp.float32)]).reshape(1, 1, 3 * dim_head)
    wqkv_h = (wqkv_h.astype(jnp.float32) * qkv_scale).astype(matmul_dtype)
    wo_h = wo.reshape(heads, dim_head, dim).astype(matmul_dtype)
    bo2 = bo.reshape(1, dim).astype(jnp.float32)
    x_in = x.astype(matmul_dtype)          # halves activation DMA bytes for bf16

    kernel = functools.partial(_attention_kernel, matmul_dtype=matmul_dtype)

    grid = (batch // block_b, heads)
    return pl.pallas_call(
        kernel,
        grid=grid,
        in_specs=[
            pl.BlockSpec((block_b, n, dim), lambda i, h: (i, 0, 0)),
            pl.BlockSpec((1, dim, 3 * dim_head), lambda i, h: (h, 0, 0)),
            pl.BlockSpec((1, dim_head, dim), lambda i, h: (h, 0, 0)),
            pl.BlockSpec((1, dim), lambda i, h: (0, 0)),
        ],
        out_specs=pl.BlockSpec((block_b, n, dim), lambda i, h: (i, 0, 0)),
        out_shape=jax.ShapeDtypeStruct((batch, n, dim), x.dtype),
        scratch_shapes=[pltpu.VMEM((block_b * n, dim), jnp.float32)],
        compiler_params=pltpu.CompilerParams(
            dimension_semantics=("parallel", "arbitrary"),
            # plenty for these tiles; raise at real ViT sizes / larger block_b
            vmem_limit_bytes=32 * 1024 * 1024,
        ),
    )(x_in, wqkv_h, wo_h, bo2)


def attention_reference(x, wqkv, wo, bo, *, heads, dim_head):
    """Pure-JAX f32 reference matching the PyTorch module exactly."""
    b, n, dim = x.shape
    scale = dim_head ** -0.5
    qkv = x @ wqkv
    q, k, v = jnp.split(qkv, 3, axis=-1)

    def split_heads(t):
        return t.reshape(b, n, heads, dim_head).transpose(0, 2, 1, 3)

    q, k, v = split_heads(q), split_heads(k), split_heads(v)
    dots = jnp.einsum('bhid,bhjd->bhij', q, k) * scale
    attn = jax.nn.softmax(dots, axis=-1)
    out = jnp.einsum('bhij,bhjd->bhid', attn, v)
    out = out.transpose(0, 2, 1, 3).reshape(b, n, heads * dim_head)
    return out @ wo + bo


if __name__ == "__main__":
    batch, seq, dim = 2, 8, 32
    heads, dim_head = 2, 16
    inner = heads * dim_head

    key = jax.random.PRNGKey(0)
    kx, kq, ko, kb = jax.random.split(key, 4)
    x = jax.random.normal(kx, (batch, seq, dim), jnp.float32)
    wqkv = jax.random.normal(kq, (dim, 3 * inner), jnp.float32) / jnp.sqrt(dim)
    wo = jax.random.normal(ko, (inner, dim), jnp.float32) / jnp.sqrt(inner)
    bo = 0.1 * jax.random.normal(kb, (dim,), jnp.float32)

    y_ref = attention_reference(x, wqkv, wo, bo, heads=heads, dim_head=dim_head)

    # f32 matmul path: tight structural check.
    y_f32 = attention(x, wqkv, wo, bo, heads=heads, dim_head=dim_head,
                      matmul_dtype=jnp.float32)
    jax.block_until_ready(y_f32)
    assert y_f32.shape == (batch, seq, dim)
    assert jnp.allclose(y_f32, y_ref, rtol=2e-2, atol=2e-2), (
        "f32 max abs err %.3e" % float(jnp.max(jnp.abs(y_f32 - y_ref))))

    # default bf16-matmul path (MXU-native), f32 accumulation -> looser tolerance.
    y = attention(x, wqkv, wo, bo, heads=heads, dim_head=dim_head)
    jax.block_until_ready(y)
    assert y.shape == (batch, seq, dim)
    assert jnp.allclose(y, y_ref, rtol=7.5e-2, atol=7.5e-2), (
        "bf16 max abs err %.3e" % float(jnp.max(jnp.abs(y - y_ref))))

    print("KERNEL_OK")
</pallas_src>

<mosaic_0001>
module attributes {stable_mosaic.version = 11 : i64} {
  func.func @_attention_kernel(%arg0: i32, %arg1: i32, %arg2: memref<1x8x32xf32, #tpu.memory_space<vmem>>, %arg3: memref<1x32x48xf32, #tpu.memory_space<vmem>>, %arg4: memref<1x16x32xf32, #tpu.memory_space<vmem>>, %arg5: memref<1x32xf32, #tpu.memory_space<vmem>>, %arg6: memref<1x8x32xf32, #tpu.memory_space<vmem>>, %arg7: memref<8x32xf32, #tpu.memory_space<vmem>>) attributes {dimension_semantics = [#tpu.dimension_semantics<parallel>, #tpu.dimension_semantics<arbitrary>], iteration_bounds = array<i64: 2, 2>, scalar_prefetch = 0 : i64, scratch_operands = 1 : i64, tpu.core_type = #tpu.core_type<tc>, window_params = [{transform_indices = @transform_0, window_bounds = array<i64: 1, 8, 32>}, {transform_indices = @transform_1, window_bounds = array<i64: 1, 32, 48>}, {transform_indices = @transform_2, window_bounds = array<i64: 1, 16, 32>}, {pipeline_mode = #tpu.pipeline_mode<synchronous>, transform_indices = @transform_3, window_bounds = array<i64: 1, 32>}, {transform_indices = @transform_4, window_bounds = array<i64: 1, 8, 32>}]} {
    %c0_i32 = arith.constant 0 : i32
    %0 = arith.cmpi eq, %arg1, %c0_i32 : i32
    %1 = arith.extui %0 : i1 to i32
    %c0_i32_0 = arith.constant 0 : i32
    %2 = arith.cmpi ne, %1, %c0_i32_0 : i32
    scf.if %2 {
      %cst_19 = arith.constant 0.000000e+00 : f32
      %36 = vector.broadcast %cst_19 : f32 to vector<8x32xf32>
      %c0_20 = arith.constant 0 : index
      %c0_21 = arith.constant 0 : index
      %37 = vector.load %arg7[%c0_20, %c0_21] : memref<8x32xf32, #tpu.memory_space<vmem>>, vector<8x32xf32>
      tpu.vector_store %arg7[%c0_20, %c0_21], %36 {strides = array<i32>} : memref<8x32xf32, #tpu.memory_space<vmem>>, vector<8x32xf32>,
    } else {
    }
    %c0 = arith.constant 0 : index
    %c0_1 = arith.constant 0 : index
    %c0_2 = arith.constant 0 : index
    %3 = vector.load %arg2[%c0, %c0_1, %c0_2] : memref<1x8x32xf32, #tpu.memory_space<vmem>>, vector<1x8x32xf32>
    %4 = vector.shape_cast %3 : vector<1x8x32xf32> to vector<8x32xf32>
    %c0_3 = arith.constant 0 : index
    %c0_4 = arith.constant 0 : index
    %c0_5 = arith.constant 0 : index
    %5 = vector.load %arg3[%c0_3, %c0_4, %c0_5] : memref<1x32x48xf32, #tpu.memory_space<vmem>>, vector<1x32x48xf32>
    %6 = vector.shape_cast %5 : vector<1x32x48xf32> to vector<32x48xf32>
    %cst = arith.constant dense<0.000000e+00> : vector<8x48xf32>
    %7 = tpu.matmul %4, %6, %cst {dimension_numbers = #tpu.dot_dimension_numbers<[1], [0], [0], [1], [0, 0, 1, 1], [], []>} : vector<8x32xf32>, vector<32x48xf32>, vector<8x48xf32> -> vector<8x48xf32>
    %8 = vector.extract_strided_slice %7 {offsets = [0, 0], sizes = [8, 16], strides = [1, 1]} : vector<8x48xf32> to vector<8x16xf32>
    %9 = vector.shape_cast %8 : vector<8x16xf32> to vector<1x8x16xf32>
    %10 = vector.extract_strided_slice %7 {offsets = [0, 16], sizes = [8, 16], strides = [1, 1]} : vector<8x48xf32> to vector<8x16xf32>
    %11 = vector.shape_cast %10 : vector<8x16xf32> to vector<1x8x16xf32>
    %12 = vector.extract_strided_slice %7 {offsets = [0, 32], sizes = [8, 16], strides = [1, 1]} : vector<8x48xf32> to vector<8x16xf32>
    %13 = vector.shape_cast %12 : vector<8x16xf32> to vector<1x8x16xf32>
    "tpu.trace_start"() <{level = 10 : i32, message = "bqd,bkd->bqk"}> : () -> ()
    %cst_6 = arith.constant dense<0.000000e+00> : vector<1x8x8xf32>
    %14 = tpu.matmul %9, %11, %cst_6 {dimension_numbers = #tpu.dot_dimension_numbers<[2], [2], [1], [1], [0, 0, 0, 1, 1, 1], [0], [0]>} : vector<1x8x16xf32>, vector<1x8x16xf32>, vector<1x8x8xf32> -> vector<1x8x8xf32>
    "tpu.trace_stop"() : () -> ()
    %cst_7 = arith.constant dense<0xFF800000> : vector<1x8xf32>
    %15 = vector.multi_reduction <maximumf>, %14, %cst_7 [2] : vector<1x8x8xf32> to vector<1x8xf32>
    %16 = vector.shape_cast %15 : vector<1x8xf32> to vector<1x8x1xf32>
    %17 = vector.broadcast %16 : vector<1x8x1xf32> to vector<1x8x8xf32>
    %18 = arith.subf %14, %17 : vector<1x8x8xf32>
    %19 = math.exp %18 : vector<1x8x8xf32>
    %cst_8 = arith.constant dense<0.000000e+00> : vector<1x8xf32>
    %20 = vector.multi_reduction <add>, %19, %cst_8 [2] : vector<1x8x8xf32> to vector<1x8xf32>
    %21 = vector.shape_cast %20 : vector<1x8xf32> to vector<1x8x1xf32>
    %22 = tpu.reciprocal %21 {approx = true} : vector<1x8x1xf32> -> vector<1x8x1xf32>
    %23 = vector.broadcast %22 : vector<1x8x1xf32> to vector<1x8x8xf32>
    %24 = arith.mulf %19, %23 : vector<1x8x8xf32>
    "tpu.trace_start"() <{level = 10 : i32, message = "bqk,bkd->bqd"}> : () -> ()
    %cst_9 = arith.constant dense<0.000000e+00> : vector<1x8x16xf32>
    %25 = tpu.matmul %24, %13, %cst_9 {dimension_numbers = #tpu.dot_dimension_numbers<[2], [1], [1], [2], [0, 0, 0, 1, 1, 2], [0], [0]>} : vector<1x8x8xf32>, vector<1x8x16xf32>, vector<1x8x16xf32> -> vector<1x8x16xf32>
    "tpu.trace_stop"() : () -> ()
    %c0_10 = arith.constant 0 : index
    %c0_11 = arith.constant 0 : index
    %26 = vector.load %arg7[%c0_10, %c0_11] : memref<8x32xf32, #tpu.memory_space<vmem>>, vector<8x32xf32>
    %27 = vector.shape_cast %25 : vector<1x8x16xf32> to vector<8x16xf32>
    %c0_12 = arith.constant 0 : index
    %c0_13 = arith.constant 0 : index
    %c0_14 = arith.constant 0 : index
    %28 = vector.load %arg4[%c0_12, %c0_13, %c0_14] : memref<1x16x32xf32, #tpu.memory_space<vmem>>, vector<1x16x32xf32>
    %29 = vector.shape_cast %28 : vector<1x16x32xf32> to vector<16x32xf32>
    %cst_15 = arith.constant dense<0.000000e+00> : vector<8x32xf32>
    %30 = tpu.matmul %27, %29, %cst_15 {dimension_numbers = #tpu.dot_dimension_numbers<[1], [0], [0], [1], [0, 0, 1, 1], [], []>} : vector<8x16xf32>, vector<16x32xf32>, vector<8x32xf32> -> vector<8x32xf32>
    %31 = arith.addf %26, %30 : vector<8x32xf32>
    %c0_16 = arith.constant 0 : index
    %c0_17 = arith.constant 0 : index
    %32 = vector.load %arg7[%c0_16, %c0_17] : memref<8x32xf32, #tpu.memory_space<vmem>>, vector<8x32xf32>
    tpu.vector_store %arg7[%c0_16, %c0_17], %31 {strides = array<i32>} : memref<8x32xf32, #tpu.memory_space<vmem>>, vector<8x32xf32>,
    %c1_i32 = arith.constant 1 : i32
    %33 = arith.cmpi eq, %arg1, %c1_i32 : i32
    %34 = arith.extui %33 : i1 to i32
    %c0_i32_18 = arith.constant 0 : i32
    %35 = arith.cmpi ne, %34, %c0_i32_18 : i32
    scf.if %35 {
      %c0_19 = arith.constant 0 : index
      %c0_20 = arith.constant 0 : index
      %36 = vector.load %arg7[%c0_19, %c0_20] : memref<8x32xf32, #tpu.memory_space<vmem>>, vector<8x32xf32>
      %c0_21 = arith.constant 0 : index
      %c0_22 = arith.constant 0 : index
      %37 = vector.load %arg5[%c0_21, %c0_22] : memref<1x32xf32, #tpu.memory_space<vmem>>, vector<1x32xf32>
      %38 = vector.shape_cast %37 : vector<1x32xf32> to vector<32xf32>
      %39 = vector.shape_cast %38 : vector<32xf32> to vector<1x32xf32>
      %40 = vector.broadcast %39 : vector<1x32xf32> to vector<8x32xf32>
      %41 = arith.addf %36, %40 : vector<8x32xf32>
      %42 = vector.shape_cast %41 : vector<8x32xf32> to vector<1x8x32xf32>
      %c0_23 = arith.constant 0 : index
      %c0_24 = arith.constant 0 : index
      %c0_25 = arith.constant 0 : index
      %43 = vector.load %arg6[%c0_23, %c0_24, %c0_25] : memref<1x8x32xf32, #tpu.memory_space<vmem>>, vector<1x8x32xf32>
      tpu.vector_store %arg6[%c0_23, %c0_24, %c0_25], %42 {strides = array<i32>} : memref<1x8x32xf32, #tpu.memory_space<vmem>>, vector<1x8x32xf32>,
    } else {
    }
    return
  }
  func.func @transform_0(%arg0: i32, %arg1: i32) -> (i32, i32, i32) {
    %c0_i32 = arith.constant 0 : i32
    %c0_i32_0 = arith.constant 0 : i32
    %c0_i32_1 = arith.constant 0 : i32
    return %arg0, %c0_i32, %c0_i32_0 : i32, i32, i32
  }
  func.func @transform_1(%arg0: i32, %arg1: i32) -> (i32, i32, i32) {
    %c0_i32 = arith.constant 0 : i32
    %c0_i32_0 = arith.constant 0 : i32
    %c0_i32_1 = arith.constant 0 : i32
    return %arg1, %c0_i32, %c0_i32_0 : i32, i32, i32
  }
  func.func @transform_2(%arg0: i32, %arg1: i32) -> (i32, i32, i32) {
    %c0_i32 = arith.constant 0 : i32
    %c0_i32_0 = arith.constant 0 : i32
    %c0_i32_1 = arith.constant 0 : i32
    return %arg1, %c0_i32, %c0_i32_0 : i32, i32, i32
  }
  func.func @transform_3(%arg0: i32, %arg1: i32) -> (i32, i32) {
    %c0_i32 = arith.constant 0 : i32
    %c0_i32_0 = arith.constant 0 : i32
    %c0_i32_1 = arith.constant 0 : i32
    return %c0_i32, %c0_i32_0 : i32, i32
  }
  func.func @transform_4(%arg0: i32, %arg1: i32) -> (i32, i32, i32) {
    %c0_i32 = arith.constant 0 : i32
    %c0_i32_0 = arith.constant 0 : i32
    %c0_i32_1 = arith.constant 0 : i32
    return %arg0, %c0_i32, %c0_i32_0 : i32, i32, i32
  }
}

</mosaic_0001>

<bundles_post_ra>
// kernel: tpu_custom_call.1
= control target key start
LH: loop header
LB: loop body
LE: loop exit
PB: predicated region body
PF: predicated region fallthrough
CT: control target
= control target key end

     0   :  { %s1525_s0 = inlined_call_operand.hbm [shape: f32[2,8,32], index: 0, kind: input, shape index: {}]   ;;  %s1526_s1 = inlined_call_operand.hbm [shape: f32[2,32,48], index: 1, kind: input, shape index: {}]   ;;  %s1527_s2 = inlined_call_operand.hbm [shape: f32[2,16,32], index: 2, kind: input, shape index: {}]   ;;  %s1528_s3 = inlined_call_operand.vmem [shape: f32[1,32], index: 3, kind: input, shape index: {}]   ;;  %s1529_s4 = inlined_call_operand.hbm [shape: f32[2,8,32], index: 4, kind: output, shape index: {}]  }
   0x1   :  { %1540 = sst [smem:[#allocation20_spill]] %s1526_s1 }
   0x2   :  { %1541 = sst [smem:[#allocation21_spill]] %s1528_s3 }
   0x3   :  { %1542 = sst [smem:[#allocation22_spill]] %s1529_s4 }
   0x4   :  { %9 = vsyncpa [#allocation4], 0 }
   0x5   :  { %11 = vsyncpa [#allocation4 + $0x1], 0 }
   0x6   :  { %12 = vsyncpa [#allocation7], 0 }
   0x7   :  { %14 = vsyncpa [#allocation7 + $0x1], 0 }
   0x8   :  { %15 = vsyncpa [#allocation5], 0 }
   0x9   :  { %17 = vsyncpa [#allocation5 + $0x1], 0  ;;  %s1223_s15 = smov 0   ;;  %s1225_s16 = smov 0  }
   0xa   :  { %s1227_s17 = smov 0   ;;  %s1229_s18 = smov 0  }
   0xb   :  { %s1231_s19 = smov 0   ;;  %s1233_s20 = smov 0  }
   0xc   :  { %s1235_s21 = smov 0   ;;  %s1237_s22 = smov 0  }
   0xd   :  { %s1239_s23 = smov 0   ;;  %s1241_s24 = smov 0  }
   0xe   :  { %s1243_s25 = smov 0  }
   0xf LB: > { %1543 = sst [smem:[#allocation13_spill]] %s1165_s20  ;;  %s32_s26 = sadd.s32 1, %s1177_s23  ;;  %s1185_s25 = sphi %s1243_s25, %s23_s25   ;;  %s1181_s24 = sphi %s1241_s24, %s1581_s24   ;;  %s1177_s23 = sphi %s1239_s23, %s1580_s23   ;;  %s1173_s22 = sphi %s1237_s22, %s1571_s22   ;;  %s1169_s21 = sphi %s1235_s21, %s1579_s21   ;;  %s1165_s20 = sphi %s1233_s20, %s1570_s20   ;;  %s1161_s19 = sphi %s1231_s19, %s1578_s19   ;;  %s1157_s18 = sphi %s1229_s18, %s1577_s18   ;;  %s1153_s17 = sphi %s1227_s17, %s1576_s17   ;;  %s1149_s16 = sphi %s1225_s16, %s1575_s16   ;;  %s1145_s15 = sphi %s1223_s15, %s1574_s15  }
  0x10   : > { %1544 = sst [smem:[#allocation14_spill]] %s1173_s22  ;;  %p50_p0 = scmp.eq.s32.totalorder %s1185_s25, 0 }
  0x11   : > { %1545 = sst [smem:[#allocation15_spill]] %s1181_s24  ;;  %s68_s27 = sadd.s32 1, %s1153_s17 }
  0x12   : > { %p75_p1 = scmp.ne.s32.totalorder %s1153_s17, %s1149_s16  ;;  %p81_p2 = scmp.ne.s32.totalorder %s1149_s16, %s1145_s15 }
  0x13   : > { %p1535_p4 = scmp.lt.s32.totalorder %s1185_s25, 4  ;;  %s199_s28 = sand.u32 1, %s1185_s25  }
  0x14   : > { %p77_p3 = por %p75_p1, %p50_p0  ;;  %s201_s29 = sand.u32 1, %s1153_s17  }
  0x15   : > { %s789_s30 = sshll.u32 %s201_s29, 5  ;;  %s812_s5 = sshll.u32 %s1177_s23, 9 }
  0x16   : > { %s1546_s1 = sld [smem:[#allocation20_spill]]  ;;  %s203_s9 = scalar_lea.vmem [#allocation6], %s789_s30 }
  0x17   : > { %s210_s10 = sshll.u32 %s203_s9, 4  ;;  %p1296_p5 = pnand %p1535_p4, %p77_p3  ;;  %s211_s10 = int_to_ptr.vmem [resolvable:$true] %s210_s10 }
  0x18   : > { %s792_s12 = sshll.u32 %s201_s29, 4  ;;  %s1300_s13 = scalar_lea.sflag [#allocation7], %s199_s28 }
  0x19   : > { %p1532_p6 = pneg %p1296_p5  ;;  %s990_s14 = scalar_lea.vmem %s211_s10, 512 }
  0x1a   : > { %p991_p7 = scmp.ne.s32.totalorder %s211_s10, %s990_s14  ;;  %s1187_s30 = smov [#allocation6]  }
  0x1c   : > { %s209_s8 = scalar_lea.hbm %s1546_s1, %s812_s5  ;;  %p993_p8 = pnand %p991_p7, %p1532_p6 }
  0x1d   : > { %s995_s5 = sshll.u32 %s1187_s30, 4  ;;  %s996_s5 = int_to_ptr.vmem [resolvable:$false] %s995_s5 }
  0x1e   : > { %p994_p9 = pneg %p993_p8  ;;  %s997_s6 = scalar_lea.vmem %s996_s5, 1024 }
  0x1f   : > { %p998_p10 = scmp.lt.s32.totalorder %s211_s10, %s996_s5  ;;  %p999_p11 = scmp.lt.s32.totalorder %s997_s6, %s990_s14 }
  0x21   : > { %p1000_p12 = por %p999_p11, %p998_p10 }
  0x23   : > { %p1001_p13 = pnand %p1000_p12, %p994_p9 }
  0x25   : > { %1004 = shalt.err (!%p1001_p13)
}
  0x26   : > { %s1530_s29 = smov 128   ;;  %s1531_s28 = smov 8  }
  0x27   : > { %868 = dma.hbm_to_vmem [thread:$0]  (!%p1296_p5), %s209_s8, 512, %s211_s10, %s1300_s13, %s1530_s29, %s1530_s29, %s1531_s28  }
  0x28   : > { %p795_p1 = scmp.ge.s32.totalorder %s1185_s25, 1  ;;  %s224_s7 = scalar_lea.vmem [#allocation8], %s792_s12 }
  0x29   : > { %s1314_s9 = sshll.u32 %s224_s7, 4  ;;  %p239_p3 = scmp.lt.s32.totalorder %s1185_s25, 5  ;;  %s232_s9 = int_to_ptr.vmem [resolvable:$true] %s1314_s9 }
  0x2a   : > { %s1322_s30 = sadd.s32 4294967295, %s1185_s25   ;;  %s784_s8 = sadd.s32 4294967294, %s1185_s25  }
  0x2b   : > { %p1317_p7 = pnand %p795_p1, %p239_p3  ;;  %p33_p8 = scmp.ge.s32.totalorder %s32_s26, 2 }
  0x2c   : > { %s35_s10 = sadd.s32 1, %s1181_s24  ;;  %s42_s12 = sadd.s32 1, %s1165_s20 }
  0x2d   : > { %s1583_s26 = smov (%p33_p8, %s32_s26), 0  ;;  %s1585_s10 = smov (!%p33_p8, %s35_s10), %s1181_s24 }
  0x2e   : > { %1549 = sst [smem:[#allocation16_spill]] %s1583_s26  ;;  %p49_p9 = scmp.ne.s32.totalorder %s1165_s20, %s1161_s19 }
  0x2f   : > { %p55_p10 = scmp.ne.s32.totalorder %s1161_s19, %s1157_s18  ;;  %p37_p11 = scmp.ge.s32.totalorder %s1585_s10, 2 }
  0x30   : > { %p56_p12 = scmp.eq.s32.totalorder %s1322_s30, 0  ;;  %p1344_p13 = por %p50_p0, %p49_p9 }
  0x31   : > { %s65_s6 = ssub.s32 %s1177_s23, %s1583_s26  ;;  %s1587_s10 = smov (%p37_p11, %s1585_s10), 0 }
  0x32   : > { %1551 = sst [smem:[#allocation17_spill]] %s1587_s10  ;;  %p1355_p1 = por %p56_p12, %p55_p10 }
  0x33   : > { %p66_p3 = scmp.eq.s32.totalorder %s65_s6, 0  ;;  %s39_s29 = ssub.s32 %s1181_s24, %s1587_s10 }
  0x34   : > { %p1364_p8 = por %p81_p2, %p56_p12  ;;  %p40_p0 = scmp.eq.s32.totalorder %s39_s29, 0 }
  0x35   : > { %p152_p6 = scmp.eq.s32.totalorder %s1322_s30, 3  ;;  %p158_p4 = scmp.eq.s32.totalorder %s784_s8, 3 }
  0x36   : > { %s1372_s1 = scalar_select %p66_p3, %s1153_s17, %s68_s27  }
  0x37   : > { %s1375_s26 = scalar_select %p40_p0, %s1165_s20, %s42_s12  }
  0x38   : > { %1554 = sst [smem:[#allocation18_spill]] %s1372_s1  ;;  %p1380_p11 = por %p152_p6, %p49_p9 }
  0x39   : > { %1555 = sst [smem:[#allocation19_spill]] %s1375_s26  ;;  %s181_s6 = sand.u32 1, %s1165_s20  }
  0x3a   : > { %s1556_s4 = scalar_select %p1380_p11, 1, 0 }
  0x3b   : > { %s788_s15 = sshll.u32 %s1181_s24, 7  ;;  %p1389_p2 = por %p158_p4, %p55_p10 }
  0x3c   : > { %s787_s29 = sshll.u32 %s181_s6, 3  ;;  %s190_s27 = scalar_lea.hbm %s1525_s0, %s788_s15 }
  0x3d   : > { %s1557_s10 = scalar_select %p1389_p2, 1, 0 }
  0x3e   : > { %p1558_p12 = scmp.lt.s32.totalorder %s1185_s25, 4  ;;  %s185_s8 = scalar_lea.vmem [#allocation3], %s787_s29 }
  0x3f   : > { %s192_s26 = sshll.u32 %s185_s8, 4  ;;  %s813_s24 = sshll.u32 %s1177_s23, 8  ;;  %s193_s26 = int_to_ptr.vmem [resolvable:$true] %s192_s26 }
  0x40   : > { %p1400_p3 = pnand %p1558_p12, %p1344_p13  ;;  %s182_s20 = scalar_lea.sflag [#allocation4], %s181_s6 }
  0x41   : > { %s1018_s1 = scalar_lea.vmem %s193_s26, 128  ;;  %s1190_s3 = smov [#allocation3]  }
  0x42   : > { %p1007_p4 = pneg %p1400_p3  ;;  %p1019_p6 = scmp.ne.s32.totalorder %s193_s26, %s1018_s1 }
  0x43   : > { %s1023_s22 = sshll.u32 %s1190_s3, 4  ;;  %s1024_s22 = int_to_ptr.vmem [resolvable:$false] %s1023_s22 }
  0x44   : > { %p1021_p9 = pnand %p1019_p6, %p1007_p4  ;;  %s1025_s5 = scalar_lea.vmem %s1024_s22, 256 }
  0x45   : > { %p1026_p13 = scmp.lt.s32.totalorder %s193_s26, %s1024_s22  ;;  %p1027_p0 = scmp.lt.s32.totalorder %s1025_s5, %s1018_s1 }
  0x46   : > { %p1022_p10 = pneg %p1021_p9 }
  0x47   : > { %p1028_p12 = por %p1027_p0, %p1026_p13 }
  0x49   : > { %p1029_p2 = pnand %p1028_p12, %p1022_p10 }
  0x4b   : > { %1032 = shalt.err (!%p1029_p2)
}
  0x4c   : > { %865 = dma.hbm_to_vmem [thread:$0]  (!%p1400_p3), %s190_s27, 128, %s193_s26, %s182_s20  }
  0x4d   : > { %s230_s29 = scalar_lea.hbm %s1527_s2, %s813_s24  ;;  %s1046_s8 = scalar_lea.vmem %s232_s9, 256 }
  0x4e   : > { %p1047_p4 = scmp.ne.s32.totalorder %s232_s9, %s1046_s8  ;;  %p1560_p6 = pneg %p1296_p5 }
  0x4f   : > { %s1191_s1 = smov [#allocation8]  }
  0x50   : > { %p1049_p9 = pnand %p1047_p4, %p1560_p6  ;;  %s1051_s3 = sshll.u32 %s1191_s1, 4  ;;  %s1052_s3 = int_to_ptr.vmem [resolvable:$false] %s1051_s3 }
  0x51   : > { %s1053_s22 = scalar_lea.vmem %s1052_s3, 512  ;;  %p1054_p2 = scmp.lt.s32.totalorder %s232_s9, %s1052_s3 }
  0x52   : > { %p1050_p11 = pneg %p1049_p9  ;;  %p1055_p10 = scmp.lt.s32.totalorder %s1053_s22, %s1046_s8 }
  0x54   : > { %p1056_p13 = por %p1055_p10, %p1054_p2 }
  0x56   : > { %p1057_p0 = pnand %p1056_p13, %p1050_p11 }
  0x58   : > { %1060 = shalt.err (!%p1057_p0)
}
  0x59   : > { %s1561_s20 = smov 8   ;;  %s1562_s24 = smov 128  }
  0x5a   : > { %871 = dma.hbm_to_vmem [thread:$0]  (!%p1296_p5), %s230_s29, 256, %s232_s9, %s1300_s13, %s1562_s24, %s1562_s24, %s1561_s20  }
  0x5b   : > { %243 = sbr.rel (%p1317_p7) target bundleno = 1361 (0x551), region = 36  ;;  %s1425_s26 = sand.u32 (!%p1317_p7), 1, %s1161_s19  }
  0x5c   : > { %s796_s27 = sshll.u32 (!%p1317_p7), %s1425_s26, 3  ;;  %s246_s12 = scalar_lea.sflag (!%p1317_p7), [#allocation4], %s1425_s26 }
  0x5d   : > { %s1429_s5 = scalar_lea.vmem (!%p1317_p7), [#allocation3], %s796_s27 }
  0x60   : > { %1132 = dma.done.wait (%p1355_p1), %s246_s12, 128  }
  0x61   : > { %1134 = vsyncadd (%p1355_p1), %s246_s12, 4294967168  ;;  %s254_s11 = sand.u32 1, %s1322_s30   ;;  %s256_s13 = sand.u32 1, %s1149_s16  }
  0x62   : > { %s797_s9 = sshll.u32 %s256_s13, 5  ;;  %s255_s14 = scalar_lea.sflag [#allocation7], %s254_s11 }
  0x63   : > { %s258_s6 = scalar_lea.vmem [#allocation6], %s797_s9 }
  0x64   : > { %1136 = dma.done.wait (%p1364_p8), %s255_s14, 768  }
  0x65   : > { %1138 = vsyncadd (%p1364_p8), %s255_s14, 4294966528  ;;  %s1441_s15 = sshll.u32 %s256_s13, 4  ;;  %s1444_s8 = scalar_lea.vmem [#allocation9], %s796_s27 }
  0x66   : > { %s267_s29 = scalar_lea.vmem [#allocation8], %s1441_s15  ;;  %p800_p5 = scmp.ne.s32.totalorder %s1169_s21, 0 }
  0x68   : > { %305 = sbr.rel (%p800_p5) target bundleno = 111 (0x6f), region = 52 }
  0x6d   : > { %vm306_vm0 = vcmask 261120   ;;  %v1192_v0 = vmov 0.0  }
  0x6e   : > { %307 = vst.msk [vmem:[#allocation2] sm:$0xff] %vm306_vm0, %v1192_v0 }
  0x6f PF: > { %v312_v1 = vld [vmem:[%s258_s6 + $0x18] sm:$0xff]  ;;  %v1193_v2 = vmov 0.0   ;;  %v311_v3 = vld [vmem:[%s258_s6 + $0x10] sm:$0xff]  ;;  %vm1194_vm1 = vmmov 0   ;;  %v310_v4 = vld [vmem:[%s258_s6 + $0x8] sm:$0xff]  ;;  %vm313_vm2 = vcmask 261120  }
  0x70   : > { %826 = vmatprep.subr.mxu0 %v1193_v2  ;;  %834 = vmatprep.mubr.msk.f32.mxu0 %vm1194_vm1, %v1193_v2  ;;  %v309_v5 = vld [vmem:[%s258_s6] sm:$0xff]  ;;  %v308_v6 = vld [vmem:[%s1429_s5] sm:$0xff]  ;;  %s1195_s28 = smov 112   ;;  %vm390_vm3 = vcmask 130048   ;;  %vm465_vm4 = vcmask 64512   ;;  %s1196_s30 = smov 96  }
  0x71   : > { %827 = vmatpush3.msra.mxu0 %v312_v1  ;;  %837 = vmatprep.subr.mxu1 %v1193_v2  ;;  %v555_v18 = vld [vmem:[%s267_s29 + $0x8] sm:$0xff]  ;;  %v554_v19 = vld [vmem:[%s267_s29] sm:$0xff]  ;;  %p806_p7 = scmp.ne.s32.totalorder %s1169_s21, 1 }
  0x72   : > { %828 = vmatprep.subr.mxu0 %v1193_v2  ;;  %839 = vmatprep.mubr.msk.f32.mxu1 %vm1194_vm1, %v1193_v2  ;;  %s1563_s3 = sld [smem:[#allocation21_spill]] (!%p806_p7) }
  0x73   : > { %829 = vmatpush3.msra.mxu0 %v311_v3 }
  0x74   : > { %830 = vmatprep.subr.mxu0 %v1193_v2 }
  0x75   : > { %831 = vmatpush3.msra.mxu0 %v310_v4  ;;  %v553_v26 = vld [vmem:[#allocation2] sm:$0xff] }
  0x76   : > { %832 = vmatprep.subr.mxu0 %v1193_v2 }
  0x77   : > { %833 = vmatpush3.msra.mxu0 %v309_v5 }
  0x78   : > { %835 = vmatmul.mubr.msk.f32.vlgmr.msra.gmra.mxu0 %vm313_vm2, %v308_v6  ;;  %847 = vmatprep.subr.mxu0 %v1193_v2 }
  0x79   : > { %851 = vmatprep.mubr.msk.f32.mxu0 %vm1194_vm1, %v1193_v2  ;;  %848 = vmatpush3.msra.mxu0 %v555_v18 }
  0x7a   : > { %849 = vmatprep.subr.mxu0 %v1193_v2 }
  0x7b   : > { %850 = vmatpush3.msra.mxu0 %v554_v19 }
 0x138   : > { %v383_v7 = vpop.f32.mrf.mxu0 }
 0x139   : > { %388 = vrot.lane.b32.xlu0 %v383_v7, %s1195_s28 }
 0x13a   : > { %v836_v8 = vpop.f32.mrf.mxu0 }
 0x1ab   : > { %v389_v9 = vpop.permute.xlu0 %388 }
 0x1ac   : > { %838 = vmatpush3.xpose.msk.msra.mxu1 %vm390_vm3, %v389_v9 }
 0x1ad   : > { %842 = vmatprep.subr.mxu1 %v1193_v2 }
 0x1af   : > { %840 = vmatmul.mubr.msk.f32.vlgmr.msra.gmra.mxu1 %vm390_vm3, %v383_v7 }
 0x1b0   : > { %844 = vmatprep.mubr.msk.f32.mxu1 %vm1194_vm1, %v1193_v2 }
 0x26f   : > { %v461_v10 = vpop.f32.mrf.mxu1 }
 0x270   : > { %v466_v11 = vsel %vm465_vm4, %v461_v10, -inf }
 0x271   : > { %467 = vmax.xlane.f32.xlu0 %v466_v11  ;;  %v841_v12 = vpop.f32.mrf.mxu1 }
 0x2fa   : > { %v468_v13 = vpop.xlane.xlu0 %467 }
 0x2fb   : > { %v469_v14 = vsub.f32 %v461_v10, %v468_v13 }
 0x2fd   : > { %v470_v15 = vmul.f32 1.442695, %v469_v14 }
 0x2ff   : > { %973 = vpow2.f32 %v470_v15 }
 0x30c   : > { %v974_v16 = vpop.eup %973 }
 0x30d   : > { %v472_v17 = vsel %vm465_vm4, %v974_v16, 0.0 }
 0x30e   : > { %473 = vadd.xlane.f32.xlu1 %v472_v17 }
 0x31f   : > { %477 = vrot.lane.b32.xlu1 %v383_v7, %s1196_s30 }
 0x397   : > { %v474_v20 = vpop.xlane.xlu1 %473 }
 0x398   : > { %975 = vrcp.f32 %v474_v20 }
 0x39b   : > { %v478_v21 = vpop.permute.xlu1 %477 }
 0x39c   : > { %843 = vmatpush3.msra.mxu1 %v478_v21 }
 0x3a5   : > { %v976_v22 = vpop.eup %975 }
 0x3a6   : > { %v476_v23 = vmul.f32 %v976_v22, %v974_v16 }
 0x3a8   : > { %845 = vmatmul.mubr.msk.f32.vlgmr.msra.gmra.mxu1 %vm465_vm4, %v476_v23 }
 0x468   : > { %v549_v24 = vpop.f32.mrf.mxu1 }
 0x469   : > { %852 = vmatmul.mubr.msk.f32.vlgmr.msra.gmra.mxu0 %vm390_vm3, %v549_v24 }
 0x46a   : > { %v846_v25 = vpop.f32.mrf.mxu1 }
 0x528   : > { %634 = sbr.rel (%p806_p7) target bundleno = 1335 (0x537), region = 56 }
 0x529   : > { %v625_v27 = vpop.f32.mrf.mxu0 }
 0x52a   : > { %v629_v28 = vadd.f32 %v625_v27, %v553_v26 }
 0x52b   : > { %v853_v29 = vpop.f32.mrf.mxu0 }
 0x52c   : > { %630 = vst.msk [vmem:[#allocation2] sm:$0xff] %vm313_vm2, %v629_v28 }
 0x52d   : > { %v807_v31 = vld [vmem:[%s1563_s3] ss:$0 sm:$0xff] }
 0x533   : > { %v635_v30 = vld [vmem:[#allocation2] sm:$0xff] }
 0x534   : > { %v643_v32 = vadd.f32 %v807_v31, %v635_v30 }
 0x536   : > { %644 = vst.msk [vmem:[%s1444_s8] sm:$0xff] %vm313_vm2, %v643_v32 }
 0x537 PF: > { %s1564_s22 = sld [smem:[#allocation14_spill]]  ;;  %s659_s5 = sshll.u32 %s1444_s8, 4  ;;  %s660_s5 = int_to_ptr.vmem [resolvable:$true] %s659_s5 }
 0x538   : > { %s1565_s12 = sld [smem:[#allocation22_spill]]  ;;  %s646_s11 = scalar_lea.sflag [#allocation5], %s1425_s26 }
 0x539   : > { %s1061_s13 = scalar_lea.vmem %s660_s5, 128  ;;  %p1566_p8 = scmp.ne.s32.totalorder %s1556_s4, 0 }
 0x53a   : > { %p1062_p1 = scmp.ne.s32.totalorder %s660_s5, %s1061_s13  ;;  %s1197_s9 = smov [#allocation9]  }
 0x53b   : > { %s1065_s14 = sshll.u32 %s1197_s9, 4  ;;  %s1066_s14 = int_to_ptr.vmem [resolvable:$false] %s1065_s14 }
 0x53c   : > { %p1063_p11 = pnand %p1062_p1, %p1566_p8  ;;  %s1067_s6 = scalar_lea.vmem %s1066_s14, 256 }
 0x53d   : > { %s809_s20 = sshll.u32 %s1564_s22, 7  ;;  %p1068_p12 = scmp.lt.s32.totalorder %s660_s5, %s1066_s14 }
 0x53e   : > { %s657_s21 = scalar_lea.hbm %s1565_s12, %s809_s20  ;;  %p1064_p3 = pneg %p1063_p11 }
 0x53f   : > { %p1069_p4 = scmp.lt.s32.totalorder %s1067_s6, %s1061_s13 }
 0x541   : > { %p1070_p6 = por %p1069_p4, %p1068_p12 }
 0x543   : > { %p1071_p9 = pnand %p1070_p6, %p1064_p3 }
 0x545   : > { %1074 = shalt.err (!%p1071_p9)
}
 0x546   : > { %s1075_s15 = scalar_lea.hbm %s657_s21, 128  ;;  %s1079_s8 = scalar_lea.hbm %s1565_s12, 256 }
 0x547   : > { %p1076_p2 = scmp.ne.s32.totalorder %s657_s21, %s1075_s15  ;;  %p1080_p0 = scmp.lt.s32.totalorder %s657_s21, %s1565_s12 }
 0x548   : > { %p1081_p5 = scmp.lt.s32.totalorder %s1079_s8, %s1075_s15 }
 0x549   : > { %p1077_p10 = pnand %p1076_p2, %p1566_p8 }
 0x54a   : > { %p1082_p7 = por %p1081_p5, %p1080_p0 }
 0x54b   : > { %p1078_p13 = pneg %p1077_p10 }
 0x54d   : > { %p1083_p1 = pnand %p1082_p7, %p1078_p13 }
 0x54f   : > { %1086 = shalt.err (!%p1083_p1)
}
 0x550   : > { %860 = dma.vmem_to_hbm [thread:$0]  (%p1566_p8), %s660_s5, 128, %s657_s21, %s646_s11  }
 0x551 PF: > { %p877_p11 = scmp.ge.s32.totalorder %s1185_s25, 2  ;;  %s671_s7 = sand.u32 1, %s1157_s18  }
 0x552   : > { %p1567_p3 = scmp.ne.s32.totalorder %s1557_s10, 0  ;;  %s672_s1 = scalar_lea.sflag [#allocation5], %s671_s7 }
 0x554   : > { %p873_p12 = pnand %p877_p11, %p1567_p3 }
 0x556   : > { %p874_p4 = pneg %p873_p12 }
 0x558   : > { %1140 = dma.done.wait (%p874_p4), %s672_s1, 128  }
 0x559   : > { %1142 = vsyncadd (%p874_p4), %s672_s1, 4294967168  ;;  %s23_s25 = sadd.s32 1, %s1185_s25   ;;  %s1568_s3 = sld [smem:[#allocation18_spill]] }
 0x55a   : > { %p20_p6 = scmp.ge.s32.totalorder %s23_s25, 6   ;;  %s1569_s4 = sld [smem:[#allocation13_spill]] }
 0x55b   : > { %s1570_s20 = sld [smem:[#allocation19_spill]]  ;;  %s1574_s15 = smov %s1149_s16 }
 0x55c   : > { %s1571_s22 = sld [smem:[#allocation15_spill]]  ;;  %s1575_s16 = smov %s1153_s17 }
 0x55d   : > { %s1572_s24 = sld [smem:[#allocation16_spill]]  ;;  %s1577_s18 = smov %s1161_s19 }
 0x55e   : > { %s1573_s27 = sld [smem:[#allocation17_spill]]  ;;  %s1579_s21 = smov %s1177_s23 }
 0x55f   : > { %s1576_s17 = smov %s1568_s3 }
 0x560   : > { %s1578_s19 = smov %s1569_s4  ;;  %22 = sbr.rel (!%p20_p6) target bundleno = 15 (0xf), region = 113 }
 0x563   : > { %s1580_s23 = smov %s1572_s24 }
 0x564   : > { %s1581_s24 = smov %s1573_s27 }
 0x565   :  { %677 = vsyncpa [#allocation4], 1 }
 0x566   :  { %679 = vsyncpa [#allocation4 + $0x1], 1 }
 0x567   :  { %680 = vsyncpa [#allocation7], 1 }
 0x568   :  { %682 = vsyncpa [#allocation7 + $0x1], 1 }
 0x569   :  { %683 = vsyncpa [#allocation5], 1 }
 0x56a   :  { %685 = vsyncpa [#allocation5 + $0x1], 1 }

</bundles_post_ra>
